<compile_context>
chip_gen: v6e
topology: v6e:2x2x1
jax: 0.10.0
libtpu: 0.0.40
codegen_flags: <defaults>
</compile_context>

<pallas_src>
import numpy as np
import jax
import jax.numpy as jnp
from jax.experimental import pallas as pl
from jax.experimental.pallas import tpu as pltpu


def _round_up(x, m):
    return -(-x // m) * m


def _time_encoder_kernel(t_ref, wb_ref, o_ref):
    # t_ref : (TN, 1)  block of time steps (sublane-major column)
    # wb_ref: (2, D)   row 0 = frequencies w, row 1 = bias b (resident)
    # o_ref : (TN, D)  output block in the same layout as the PyTorch result
    t = t_ref[...]                 # (TN, 1)
    w = wb_ref[0:1, :]             # (1, D)
    b = wb_ref[1:2, :]             # (1, D)
    # Lane-broadcast t, sublane-broadcast w/b, then cos (VPU + EUP, no MXU).
    o_ref[...] = jnp.cos(t * w + b).astype(o_ref.dtype)


def _choose_tile_n(n, dim, max_tile_n):
    """Pick the sublane tile over N (multiple of 8, VMEM-budget capped)."""
    lane_tiles = -(-dim // 128)
    # Double-buffered t column + output block, both padded to 128-lane tiles:
    # bytes per row of the block = 2 * (512 + 512 * ceil(dim/128)).
    bytes_per_row = 1024 * (1 + lane_tiles)
    cap = max(8, ((8 << 20) // bytes_per_row) // 8 * 8)
    n8 = _round_up(max(n, 1), 8)
    tile = min(n8, max(8, (max_tile_n // 8) * 8), cap)
    # Prefer >= 2 grid steps on sizeable inputs so the "parallel" grid axis
    # can be sharded across TensorCores (megacore / v7x: 2 TCs).
    if tile >= n8 and n8 >= 1024:
        tile = _round_up(n8 // 2, 8)
    return tile


def time_encoder_forward(t, w, b, *, max_tile_n=4096, out_dtype=jnp.float32):
    """Pallas TimeEncoder forward.

    Args:
      t: arbitrary-shaped array of time steps (any float/int dtype).
      w: (dim,) frequency weights (== nn.Linear(1, dim).weight.squeeze(-1)).
      b: (dim,) bias.
      max_tile_n: upper bound on the per-step row tile (multiple of 8).
      out_dtype: output dtype. float32 matches the PyTorch module; pass
        jnp.bfloat16 to halve HBM writeback if the consumer tolerates it.
    Returns:
      cos(t.reshape(-1,1) * w[None,:] + b), squeezed like torch .squeeze().
    """
    dim = int(w.shape[0])
    t_col = jnp.asarray(t, jnp.float32).reshape(-1, 1)          # (N, 1)
    n = t_col.shape[0]

    tile_n = _choose_tile_n(n, dim, max_tile_n)
    grid = pl.cdiv(n, tile_n)

    wb = jnp.stack([jnp.asarray(w, jnp.float32),
                    jnp.asarray(b, jnp.float32)], axis=0)       # (2, dim)

    out = pl.pallas_call(
        _time_encoder_kernel,
        out_shape=jax.ShapeDtypeStruct((n, dim), out_dtype),
        grid_spec=pltpu.PrefetchScalarGridSpec(
            num_scalar_prefetch=0,
            grid=(grid,),
            in_specs=[
                pl.BlockSpec((tile_n, 1), lambda i: (i, 0)),    # t column block
                pl.BlockSpec((2, dim), lambda i: (0, 0)),       # w|b (resident)
            ],
            out_specs=pl.BlockSpec((tile_n, dim), lambda i: (i, 0)),
        ),
        compiler_params=pltpu.CompilerParams(
            dimension_semantics=("parallel",)),
    )(t_col, wb)

    return jnp.squeeze(out)               # match torch .squeeze()


def make_time_encoder_params(dim):
    """Deterministic parameters identical to TimeEncoder.reset_parameters()."""
    w = (1.0 / 10.0 ** np.linspace(0, 9, dim, dtype=np.float32)).astype(np.float32)
    b = np.zeros((dim,), dtype=np.float32)
    return jnp.asarray(w), jnp.asarray(b)


def _ref(t, w, b):
    dim = w.shape[0]
    return jnp.squeeze(jnp.cos(jnp.asarray(t, jnp.float32).reshape(-1, 1)
                               * w.reshape(1, dim) + b.reshape(1, dim)))


if __name__ == "__main__":
    # --- check 1: small test shape (dim=32, 16 time steps) -------------------
    dim = 32
    batch, seq = 2, 8
    key = jax.random.PRNGKey(0)
    t = jax.random.uniform(key, (batch, seq), dtype=jnp.float32) * 100.0
    w, b = make_time_encoder_params(dim)

    out = jax.block_until_ready(time_encoder_forward(t, w, b))
    np.testing.assert_allclose(np.asarray(out), np.asarray(_ref(t, w, b)),
                               rtol=1e-5, atol=1e-5)
    assert out.shape == (batch * seq, dim)

    # --- check 2: GraphMixer dim=100, N=105 (not a multiple of 8) ------------
    dim2 = 100
    t2 = jax.random.uniform(jax.random.PRNGKey(1), (3, 7, 5),
                            dtype=jnp.float32) * 100.0
    w2, b2 = make_time_encoder_params(dim2)
    out2 = jax.block_until_ready(time_encoder_forward(t2, w2, b2))
    np.testing.assert_allclose(np.asarray(out2), np.asarray(_ref(t2, w2, b2)),
                               rtol=1e-5, atol=1e-5)
    assert out2.shape == (3 * 7 * 5, dim2)

    # --- check 3: multi-step grid with a partial boundary block --------------
    dim3 = 100
    t3 = jax.random.uniform(jax.random.PRNGKey(2), (3000,),
                            dtype=jnp.float32) * 1e6
    w3, b3 = make_time_encoder_params(dim3)
    out3 = jax.block_until_ready(time_encoder_forward(t3, w3, b3))
    np.testing.assert_allclose(np.asarray(out3), np.asarray(_ref(t3, w3, b3)),
                               rtol=1e-5, atol=1e-5)
    assert out3.shape == (3000, dim3)

    print("KERNEL_OK")
</pallas_src>

<mosaic_0001>
module attributes {stable_mosaic.version = 11 : i64} {
  func.func @_time_encoder_kernel(%arg0: i32, %arg1: memref<16x1xf32, #tpu.memory_space<vmem>>, %arg2: memref<2x32xf32, #tpu.memory_space<vmem>>, %arg3: memref<16x32xf32, #tpu.memory_space<vmem>>) attributes {dimension_semantics = [#tpu.dimension_semantics<parallel>], iteration_bounds = array<i64: 1>, scalar_prefetch = 0 : i64, scratch_operands = 0 : i64, tpu.core_type = #tpu.core_type<tc>, window_params = [{transform_indices = @transform_0, window_bounds = array<i64: 16, 1>}, {pipeline_mode = #tpu.pipeline_mode<synchronous>, transform_indices = @transform_1, window_bounds = array<i64: 2, 32>}, {transform_indices = @transform_2, window_bounds = array<i64: 16, 32>}]} {
    %c0 = arith.constant 0 : index
    %c0_0 = arith.constant 0 : index
    %0 = vector.load %arg1[%c0, %c0_0] : memref<16x1xf32, #tpu.memory_space<vmem>>, vector<16x1xf32>
    %c0_1 = arith.constant 0 : index
    %c0_2 = arith.constant 0 : index
    %1 = vector.load %arg2[%c0_1, %c0_2] : memref<2x32xf32, #tpu.memory_space<vmem>>, vector<1x32xf32>
    %c1 = arith.constant 1 : index
    %c0_3 = arith.constant 0 : index
    %2 = vector.load %arg2[%c1, %c0_3] : memref<2x32xf32, #tpu.memory_space<vmem>>, vector<1x32xf32>
    %3 = vector.broadcast %0 : vector<16x1xf32> to vector<16x32xf32>
    %4 = vector.broadcast %1 : vector<1x32xf32> to vector<16x32xf32>
    %5 = arith.mulf %3, %4 : vector<16x32xf32>
    %6 = vector.broadcast %2 : vector<1x32xf32> to vector<16x32xf32>
    %7 = arith.addf %5, %6 : vector<16x32xf32>
    %8 = math.cos %7 : vector<16x32xf32>
    %c0_4 = arith.constant 0 : index
    %c0_5 = arith.constant 0 : index
    %9 = vector.load %arg3[%c0_4, %c0_5] : memref<16x32xf32, #tpu.memory_space<vmem>>, vector<16x32xf32>
    tpu.vector_store %arg3[%c0_4, %c0_5], %8 {strides = array<i32>} : memref<16x32xf32, #tpu.memory_space<vmem>>, vector<16x32xf32>,
    return
  }
  func.func @transform_0(%arg0: i32) -> (i32, i32) {
    %c0_i32 = arith.constant 0 : i32
    %c0_i32_0 = arith.constant 0 : i32
    return %arg0, %c0_i32 : i32, i32
  }
  func.func @transform_1(%arg0: i32) -> (i32, i32) {
    %c0_i32 = arith.constant 0 : i32
    %c0_i32_0 = arith.constant 0 : i32
    %c0_i32_1 = arith.constant 0 : i32
    return %c0_i32, %c0_i32_0 : i32, i32
  }
  func.func @transform_2(%arg0: i32) -> (i32, i32) {
    %c0_i32 = arith.constant 0 : i32
    %c0_i32_0 = arith.constant 0 : i32
    return %arg0, %c0_i32 : i32, i32
  }
}

</mosaic_0001>

<bundles_post_ra>
// kernel: tpu_custom_call.1
= control target key start
LH: loop header
LB: loop body
LE: loop exit
PB: predicated region body
PF: predicated region fallthrough
CT: control target
= control target key end

     0   :  { %v322_v1 = vmov 0   ;;  %s440_s0 = inlined_call_operand.vmem [shape: f32[16,1], index: 0, kind: input, shape index: {}]   ;;  %s441_s1 = inlined_call_operand.vmem [shape: f32[2,32], index: 1, kind: input, shape index: {}]   ;;  %s442_s2 = inlined_call_operand.hbm [shape: f32[16,32], index: 2, kind: output, shape index: {}]  }
   0x1   :  { %v12_v0 = vld [vmem:[%s440_s0] sm:$0xff]  ;;  %291 = vset.pattern.permute.xlu0 %v322_v1  ;;  %v13_v2 = vld [vmem:[%s440_s0 + $0x8] sm:$0xff] }
   0x2   :  { %18 = vperm.xlu0 %291, %v12_v0  }
   0x3   :  { %7 = vsyncpa [#allocation3], 0  ;;  %v263_v3 = vld [vmem:[%s441_s1] ss:$0 sm:$0xff]  ;;  %v264_v4 = vld [vmem:[%s441_s1 + $0x1] ss:$0 sm:$0xff] }
   0x4   :  { %v323_v27 = vmov 683565275   ;;  %v324_v31 = vmov 2475754826   ;;  %v325_v33 = vmov 2131351028  }
   0x5   :  { %v326_v35 = vmov 2102212464   ;;  %v327_v37 = vmov 920167782   ;;  %v328_v44 = vmov 1326507024  }
   0x6   :  { %23 = vperm.xlu0 %291, %v13_v2   ;;  %s329_s0 = smov [#allocation2]  }
   0x7   :  { %s252_s1 = sshll.u32 %s329_s0, 4  ;;  %s253_s1 = int_to_ptr.vmem [resolvable:$true] %s252_s1 }
   0x8   :  { %s300_s17 = scalar_lea.vmem %s253_s1, 256  ;;  %p305_p1 = scmp.lt.s32.totalorder %s253_s1, %s253_s1 }
   0x9   :  { %p301_p0 = scmp.ne.s32.totalorder %s253_s1, %s300_s17  ;;  %p306_p2 = scmp.lt.s32.totalorder %s300_s17, %s300_s17 }
   0xb   :  { %p307_p3 = por %p306_p2, %p305_p1 }
   0xd   :  { %p308_p4 = pnand %p307_p3, %p301_p0 }
  0x7d   :  { %v19_v5 = vpop.permute.xlu0 %18 }
  0x7e   :  { %v30_v6 = vmul.f32 %v263_v3, %v19_v5 }
  0x80   :  { %v359_v7 = vadd.f32 %v264_v4, %v30_v6 }
  0x81   :  { %v24_v8 = vpop.permute.xlu0 %23 }
  0x82   :  { %v38_v9 = vand.u32 2147483647, %v359_v7  ;;  %v41_v10 = vand.u32 2139095040, %v359_v7  ;;  %v31_v11 = vmul.f32 %v263_v3, %v24_v8  ;;  %vm40_vm14 = vcmp.lt.s32.totalorder %v359_v7, 0 }
  0x84   :  { %v42_v12 = vshrl.u32 %v41_v10, 23  ;;  %v363_v13 = vadd.f32 %v264_v4, %v31_v11  ;;  %v45_v14 = vand.u32 8388607, %v38_v9  ;;  %vm412_vm15 = vcmp.le.f32.partialorder %v38_v9, 0.7853982 }
  0x86   :  { %v265_v15 = vadd.s32 4294967169, %v42_v12  ;;  %v144_v16 = vand.u32 2139095040, %v363_v13  ;;  %v46_v18 = vor.u32 8388608, %v45_v14  ;;  %v141_v20 = vand.u32 2147483647, %v363_v13 }
  0x88   :  { %v48_v17 = vadd.s32 1, %v265_v15  ;;  %v145_v19 = vshrl.u32 %v144_v16, 23  ;;  %v369_v25 = vshll.u32 %v46_v18, 8  ;;  %v148_v29 = vand.u32 8388607, %v141_v20 }
  0x8a   :  { %vm49_vm0 = vcmp.gt.s32.totalorder %v48_v17, 0  ;;  %v269_v22 = vadd.s32 4294967169, %v145_v19  ;;  %v149_v59 = vor.u32 8388608, %v148_v29 }
  0x8b   :  { %v50_v21 = vsel %vm49_vm0, %v48_v17, 0  ;;  %vm143_vm0 = vcmp.lt.s32.totalorder %v363_v13, 0 }
  0x8c   :  { %v51_v23 = vshrl.u32 %v50_v21, 5  ;;  %v52_v24 = vand.u32 31, %v50_v21  ;;  %v151_v30 = vadd.s32 1, %v269_v22  ;;  %v189_v10 = vshll.u32 %v149_v59, 8 }
  0x8e   :  { %v53_v26 = vsub.s32 32, %v52_v24  ;;  %v55_v28 = vshll.u32 %v323_v27, %v52_v24  ;;  %v58_v32 = vshll.u32 %v324_v31, %v52_v24  ;;  %v61_v34 = vshll.u32 %v325_v33, %v52_v24 }
  0x8f   :  { %v64_v36 = vshll.u32 %v326_v35, %v52_v24  ;;  %v67_v38 = vshll.u32 %v327_v37, %v52_v24  ;;  %vm70_vm1 = vcmp.lt.s32.totalorder %v51_v23, 1  ;;  %vm72_vm2 = vcmp.lt.s32.totalorder %v51_v23, 3 }
  0x90   :  { %v56_v39 = vshrl.u32 %v324_v31, %v53_v26  ;;  %v59_v40 = vshrl.u32 %v325_v33, %v53_v26  ;;  %v62_v41 = vshrl.u32 %v326_v35, %v53_v26  ;;  %v54_v42 = vshrl.u32 %v323_v27, %v53_v26 }
  0x91   :  { %v65_v43 = vshrl.u32 %v327_v37, %v53_v26  ;;  %v68_v45 = vshrl.u32 %v328_v44, %v53_v26  ;;  %vm152_vm3 = vcmp.gt.s32.totalorder %v151_v30, 0  ;;  %vm73_vm4 = vcmp.lt.s32.totalorder %v51_v23, 4 }
  0x92   :  { %v57_v46 = vor.u32 %v56_v39, %v55_v28  ;;  %v60_v47 = vor.u32 %v59_v40, %v58_v32  ;;  %v63_v48 = vor.u32 %v62_v41, %v61_v34  ;;  %v153_v51 = vsel %vm152_vm3, %v151_v30, 0 }
  0x93   :  { %v66_v49 = vor.u32 %v65_v43, %v64_v36  ;;  %v69_v50 = vor.u32 %v68_v45, %v67_v38  ;;  %vm71_vm5 = vcmp.lt.s32.totalorder %v51_v23, 2  ;;  %v155_v62 = vand.u32 31, %v153_v51 }
  0x94   :  { %v74_v52 = vsel %vm70_vm1, %v54_v42, %v57_v46  ;;  %v75_v53 = vsel %vm73_vm4, %v63_v48, 2102212464  ;;  %v78_v54 = vsel %vm70_vm1, %v57_v46, %v60_v47  ;;  %v82_v55 = vsel %vm70_vm1, %v60_v47, %v63_v48 }
  0x95   :  { %v76_v56 = vsel %vm72_vm2, %v60_v47, %v75_v53  ;;  %v79_v57 = vsel %vm73_vm4, %v66_v49, 920167782  ;;  %v83_v58 = vsel %vm73_vm4, %v69_v50, 1326507024  ;;  %v154_v6 = vshrl.u32 %v153_v51, 5 }
  0x96   :  { %v80_v60 = vsel %vm72_vm2, %v63_v48, %v79_v57  ;;  %v84_v61 = vsel %vm72_vm2, %v66_v49, %v83_v58  ;;  %v77_v63 = vsel %vm71_vm5, %v74_v52, %v76_v56  ;;  %v156_v8 = vsub.s32 32, %v155_v62 }
  0x97   :  { %v81_v0 = vsel %vm71_vm5, %v78_v54, %v80_v60  ;;  %v85_v1 = vsel %vm71_vm5, %v82_v55, %v84_v61  ;;  %v93_v11 = vmul.u32 %v369_v25, %v77_v63  ;;  %v158_v12 = vshll.u32 %v323_v27, %v155_v62 }
  0x98   :  { %v382_v2 = vmul.u32.u64.low %v369_v25, %v85_v1  ;;  %v383_v3 = vmul.u32.u64.high %v369_v25, %v85_v1, %v382_v2  ;;  %v386_v4 = vmul.u32.u64.low %v369_v25, %v81_v0  ;;  %v387_v5 = vmul.u32.u64.high %v369_v25, %v81_v0, %v386_v4 }
  0x99   :  { %v161_v14 = vshll.u32 %v324_v31, %v155_v62  ;;  %v164_v15 = vshll.u32 %v325_v33, %v155_v62  ;;  %v159_v16 = vshrl.u32 %v324_v31, %v156_v8  ;;  %v162_v17 = vshrl.u32 %v325_v33, %v156_v8 }
  0x9a   :  { %v165_v18 = vshrl.u32 %v326_v35, %v156_v8  ;;  %v167_v19 = vshll.u32 %v326_v35, %v155_v62  ;;  %vm95_vm6 = vc.u32 %v383_v3, %v386_v4  ;;  %v96_v21 = vadd.s32 1, %v387_v5 }
  0x9b   :  { %v168_v22 = vshrl.u32 %v327_v37, %v156_v8  ;;  %v170_v23 = vshll.u32 %v327_v37, %v155_v62  ;;  %v160_v24 = vor.u32 %v159_v16, %v158_v12  ;;  %v163_v26 = vor.u32 %v162_v17, %v161_v14 }
  0x9c   :  { %v166_v28 = vor.u32 %v165_v18, %v164_v15  ;;  %v171_v29 = vshrl.u32 %v328_v44, %v156_v8  ;;  %v97_v25 = vsel %vm95_vm6, %v96_v21, %v387_v5  ;;  %vm173_vm7 = vcmp.lt.s32.totalorder %v154_v6, 1 }
  0x9d   :  { %v169_v30 = vor.u32 %v168_v22, %v167_v19  ;;  %vm176_vm8 = vcmp.lt.s32.totalorder %v154_v6, 4  ;;  %v98_v31 = vadd.s32 %v97_v25, %v93_v11  ;;  %vm175_vm9 = vcmp.lt.s32.totalorder %v154_v6, 3 }
  0x9e   :  { %v172_v32 = vor.u32 %v171_v29, %v170_v23  ;;  %v178_v33 = vsel %vm176_vm8, %v166_v28, 2102212464  ;;  %v157_v34 = vshrl.u32 %v323_v27, %v156_v8  ;;  %v181_v35 = vsel %vm173_vm7, %v160_v24, %v163_v26 }
  0x9f   :  { %v182_v36 = vsel %vm176_vm8, %v169_v30, 920167782  ;;  %v185_v38 = vsel %vm173_vm7, %v163_v26, %v166_v28  ;;  %v99_v39 = vadd.s32 536870912, %v98_v31  ;;  %vm174_vm10 = vcmp.lt.s32.totalorder %v154_v6, 2 }
  0xa0   :  { %v183_v37 = vsel %vm175_vm9, %v166_v28, %v182_v36  ;;  %v186_v40 = vsel %vm176_vm8, %v172_v32, 1326507024  ;;  %v177_v41 = vsel %vm173_vm7, %v157_v34, %v160_v24  ;;  %v179_v42 = vsel %vm175_vm9, %v163_v26, %v178_v33 }
  0xa1   :  { %v184_v43 = vsel %vm174_vm10, %v181_v35, %v183_v37  ;;  %v187_v44 = vsel %vm175_vm9, %v169_v30, %v186_v40  ;;  %v100_v45 = vshrl.u32 %v99_v39, 30  ;;  %v180_v51 = vsel %vm174_vm10, %v177_v41, %v179_v42 }
  0xa2   :  { %v188_v46 = vsel %vm174_vm10, %v185_v38, %v187_v44  ;;  %v397_v47 = vmul.u32.u64.low %v189_v10, %v184_v43  ;;  %v398_v48 = vmul.u32.u64.high %v189_v10, %v184_v43, %v397_v47  ;;  %v196_v54 = vmul.u32 %v189_v10, %v180_v51 }
  0xa3   :  { %v400_v49 = vmul.u32.u64.low %v189_v10, %v188_v46  ;;  %v401_v50 = vmul.u32.u64.high %v189_v10, %v188_v46, %v400_v49  ;;  %v101_v27 = vshll.u32 %v100_v45, 30  ;;  %v94_v2 = vadd.s32 %v386_v4, %v383_v3 }
  0xa4   :  { %v199_v53 = vadd.s32 1, %v398_v48  ;;  %v124_v36 = vsub.s32 4, %v100_v45  ;;  %vm424_vm1 = vcmp.le.f32.partialorder %v141_v20, 0.7853982  ;;  %vm244_vm5 = vcmask 261120  }
  0xa5   :  { %v102_v52 = vsub.s32 %v98_v31, %v101_v27  ;;  %vm198_vm11 = vc.u32 %v401_v50, %v397_v47  ;;  %v197_v26 = vadd.s32 %v397_v47, %v401_v50  ;;  %vm130_vm6 = vweird.f32 %v359_v7 }
  0xa6   :  { %v200_v56 = vsel %vm198_vm11, %v199_v53, %v398_v48  ;;  %v125_v40 = vsel %vm40_vm14, %v124_v36, %v100_v45  ;;  %vm233_vm10 = vweird.f32 %v363_v13 }
  0xa7   :  { %v104_v55 = vsub.s32 0, %v102_v52  ;;  %v201_v57 = vadd.s32 %v200_v56, %v196_v54  ;;  %v127_v9 = vsel %vm412_vm15, 0, %v125_v40 }
  0xa8   :  { %v131_v45 = vand.u32 3, %v127_v9 }
  0xa9   :  { %v266_v58 = vmin.u32 %v104_v55, %v102_v52  ;;  %v202_v59 = vadd.s32 536870912, %v201_v57 }
  0xaa   :  { %vm136_vm2 = vcmp.eq.s32.totalorder %v131_v45, 2  ;;  %vm133_vm3 = vcmp.eq.s32.totalorder %v131_v45, 0  ;;  %vm132_vm4 = vcmp.lt.s32.totalorder %v131_v45, 2 }
  0xab   :  { %v106_v60 = vclz %v266_v58  ;;  %v203_v61 = vshrl.u32 %v202_v59, 30 }
  0xad   :  { %v267_v62 = vadd.s32 4294967294, %v106_v60  ;;  %v204_v63 = vshll.u32 %v203_v61, 30  ;;  %v227_v47 = vsub.s32 4, %v203_v61 }
  0xaf   :  { %vm268_vm12 = vcmp.lt.s32.totalorder %v267_v62, 0  ;;  %v205_v1 = vsub.s32 %v201_v57, %v204_v63  ;;  %v228_v51 = vsel %vm143_vm0, %v227_v47, %v203_v61 }
  0xb0   :  { %v109_v0 = vsel %vm268_vm12, 0, %v267_v62  ;;  %v230_v55 = vsel %vm424_vm1, 0, %v228_v51 }
  0xb1   :  { %v110_v5 = vsub.s32 32, %v109_v0  ;;  %v114_v6 = vsub.s32 4294967266, %v109_v0  ;;  %v207_v8 = vsub.s32 0, %v205_v1  ;;  %v111_v10 = vshll.u32 %v102_v52, %v109_v0 }
  0xb2   :  { %v234_v56 = vand.u32 3, %v230_v55 }
  0xb3   :  { %v112_v11 = vshrl.u32 %v94_v2, %v110_v5  ;;  %v115_v12 = vadd.s32 127, %v114_v6  ;;  %v270_v14 = vmin.u32 %v207_v8, %v205_v1 }
  0xb4   :  { %vm239_vm7 = vcmp.eq.s32.totalorder %v234_v56, 2  ;;  %vm236_vm8 = vcmp.eq.s32.totalorder %v234_v56, 0  ;;  %vm235_vm9 = vcmp.lt.s32.totalorder %v234_v56, 2 }
  0xb5   :  { %v113_v15 = vor.u32 %v112_v11, %v111_v10  ;;  %v116_v16 = vshll.u32 %v115_v12, 23  ;;  %v209_v17 = vclz %v270_v14 }
  0xb7   :  { %v117_v18 = vor.u32 4788187, %v116_v16  ;;  %v271_v19 = vadd.s32 4294967294, %v209_v17  ;;  %v120_v22 = vcvt.s32.f32 %v113_v15 }
  0xb9   :  { %v118_v21 = vand.u32 2147483647, %v117_v18  ;;  %vm272_vm13 = vcmp.lt.s32.totalorder %v271_v19, 0 }
  0xba   :  { %v212_v24 = vsel %vm272_vm13, 0, %v271_v19 }
  0xbb   :  { %v121_v23 = vmul.f32 %v120_v22, %v118_v21  ;;  %v213_v3 = vsub.s32 32, %v212_v24  ;;  %v217_v4 = vsub.s32 4294967266, %v212_v24  ;;  %v214_v29 = vshll.u32 %v205_v1, %v212_v24 }
  0xbd   :  { %v122_v28 = vxor.u32 2147483648, %v121_v23  ;;  %v215_v25 = vshrl.u32 %v197_v26, %v213_v3  ;;  %v218_v30 = vadd.s32 127, %v217_v4 }
  0xbf   :  { %v123_v32 = vsel %vm40_vm14, %v122_v28, %v121_v23  ;;  %v216_v34 = vor.u32 %v215_v25, %v214_v29  ;;  %v219_v35 = vshll.u32 %v218_v30, 23 }
  0xc0   :  { %v126_v33 = vsel %vm412_vm15, %v359_v7, %v123_v32 }
  0xc1   :  { %292 = vcosq.f32 %v126_v33  ;;  %v220_v38 = vor.u32 4788187, %v219_v35  ;;  %v223_v37 = vcvt.s32.f32 %v216_v34 }
  0xc2   :  { %294 = vsinq.f32 %v126_v33 }
  0xc3   :  { %v221_v39 = vand.u32 2147483647, %v220_v38 }
  0xc5   :  { %v224_v41 = vmul.f32 %v223_v37, %v221_v39 }
  0xc7   :  { %v225_v42 = vxor.u32 2147483648, %v224_v41 }
  0xc9   :  { %v226_v44 = vsel %vm143_vm0, %v225_v42, %v224_v41 }
  0xca   :  { %v229_v46 = vsel %vm424_vm1, %v363_v13, %v226_v44 }
  0xcb   :  { %296 = vcosq.f32 %v229_v46 }
  0xcc   :  { %298 = vsinq.f32 %v229_v46 }
  0xce   :  { %v293_v48 = vpop.eup %292 }
  0xcf   :  { %v295_v49 = vpop.eup %294  ;;  %v137_v50 = vxor.u32 2147483648, %v293_v48 }
  0xd0   :  { %v134_v27 = vxor.u32 2147483648, %v295_v49 }
  0xd1   :  { %v138_v20 = vsel %vm136_vm2, %v137_v50, %v295_v49 }
  0xd2   :  { %v135_v52 = vsel %vm133_vm3, %v293_v48, %v134_v27 }
  0xd3   :  { %v139_v53 = vsel %vm132_vm4, %v135_v52, %v138_v20 }
  0xd4   :  { %v140_v54 = vsel %vm130_vm6, nan, %v139_v53 }
  0xd5   :  { %245 = vst.msk [vmem:[#allocation2] sm:$0xff] %vm244_vm5, %v140_v54 }
  0xd8   :  { %v297_v57 = vpop.eup %296 }
  0xd9   :  { %v299_v58 = vpop.eup %298  ;;  %v240_v59 = vxor.u32 2147483648, %v297_v57 }
  0xda   :  { %v237_v60 = vxor.u32 2147483648, %v299_v58 }
  0xdb   :  { %v241_v61 = vsel %vm239_vm7, %v240_v59, %v299_v58 }
  0xdc   :  { %v238_v62 = vsel %vm236_vm8, %v297_v57, %v237_v60 }
  0xdd   :  { %v242_v7 = vsel %vm235_vm9, %v238_v62, %v241_v61 }
  0xde   :  { %v243_v63 = vsel %vm233_vm10, nan, %v242_v7 }
  0xdf   :  { %246 = vst.msk [vmem:[#allocation2 + $0x8] sm:$0xff] %vm244_vm5, %v243_v63 }
  0xe0   :  { %311 = shalt.err (!%p308_p4)
}
  0xe1   :  { %s330_s18 = smov 128   ;;  %s331_s19 = smov 8  }
  0xe2   :  { %258 = dma.vmem_to_hbm [thread:$0]  %s253_s1, 256, %s442_s2, [#allocation3], %s330_s18, %s330_s18, %s331_s19  }
  0xe3   :  { %320 = dma.done.wait [#allocation3], 256  }
  0xe4   :  { %321 = vsyncadd [#allocation3], 4294967040 }
  0xe5   :  { %262 = vsyncpa [#allocation3], 1 }

</bundles_post_ra>
